<compile_context>
chip_gen: v5e
topology: v5e:2x2
jax: 0.10.0
libtpu: 0.0.40
codegen_flags: <defaults>
</compile_context>

<pallas_src>
import math
from functools import partial

import jax
import jax.numpy as jnp
from jax.experimental import pallas as pl
from jax.experimental.pallas import tpu as pltpu

_MASK_VALUE = -1e30          # large-negative finite logit for padded keys


def _round_up(n, m):
    return ((n + m - 1) // m) * m


def _pick_tile(n, target, cap=1024):
    """Sequence tile: <= target, multiple of 8 (prefer 128), never an
    unbounded full-sequence slab (VMEM safety on v7x's 64 MiB)."""
    if n <= target:
        return _round_up(n, 8)
    for step in (128, 8):                 # prefer MXU/lane-friendly multiples
        t = target - target % step
        while t >= step:
            if n % t == 0:
                return t
            t -= step
    return min(_round_up(target, 128), cap)   # ragged: pad + mask in kernel


def _quat_attn_kernel(q_ref, qtrig_ref, k_ref, ktrig_ref, v_ref, o_ref,
                      m_sc, l_sc, acc_sc, qrot_sc, krot_sc,
                      *, kv_len, mask_tail):
    si = pl.program_id(3)

    @pl.when(si == 0)
    def _init():
        # Online-softmax running state.
        m_sc[...] = jnp.full(m_sc.shape, _MASK_VALUE, dtype=jnp.float32)
        l_sc[...] = jnp.zeros(l_sc.shape, dtype=jnp.float32)
        acc_sc[...] = jnp.zeros(acc_sc.shape, dtype=jnp.float32)

        # Query-side rotation slab is invariant along the S axis: build it
        # ONCE per (b, h, L-tile).  scale/M is already folded into qc/qs.
        q = q_ref[0, 0]                        # (tL, E)   f32
        qtrig = qtrig_ref[0, 0]                # (tL, 2M)  f32 [cos*s/M | sin*s/M]
        E = q.shape[-1]
        Eq = E // 4
        M = qtrig.shape[-1] // 2
        qc = qtrig[:, :M]
        qs = qtrig[:, M:]
        Q0, Q1, Q2, Q3 = (q[:, i * Eq:(i + 1) * Eq] for i in range(4))
        q_p = jnp.concatenate([-Q1, Q0, Q3, -Q2], axis=-1)      # partner(Q)
        for m in range(M):                     # static unroll, sliced stores
            qrot_sc[:, m * E:(m + 1) * E] = (
                q * qc[:, m:m + 1] + q_p * qs[:, m:m + 1]
            ).astype(qrot_sc.dtype)

    # ---- hot loop: key-side rotation slab (f32 VPU math, sliced stores) ----
    k = k_ref[0, 0]                            # (tS, E)   f32
    ktrig = ktrig_ref[0, 0]                    # (tS, 2M)  f32
    v = v_ref[0, 0]                            # (tS, D)   bf16 (or f32)
    E = k.shape[-1]
    Eq = E // 4
    M = ktrig.shape[-1] // 2
    kc = ktrig[:, :M]
    ks = ktrig[:, M:]
    K0, K1, K2, K3 = (k[:, i * Eq:(i + 1) * Eq] for i in range(4))
    k_p = jnp.concatenate([-K2, -K3, K0, K1], axis=-1)          # partner(K)
    for m in range(M):
        krot_sc[:, m * E:(m + 1) * E] = (
            k * kc[:, m:m + 1] + k_p * ks[:, m:m + 1]
        ).astype(krot_sc.dtype)

    # Scores: ONE deep (M*E) MXU contraction, bf16 operands / f32 accumulate.
    s = jax.lax.dot_general(
        qrot_sc[...], krot_sc[...], (((1,), (1,)), ((), ())),
        preferred_element_type=jnp.float32)                     # (tL, tS)

    if mask_tail:                              # static: only when S was padded
        tS = s.shape[-1]
        kpos = si * tS + jax.lax.broadcasted_iota(jnp.int32, s.shape, 1)
        s = jnp.where(kpos < kv_len, s, _MASK_VALUE)

    # Online softmax over the S-tile axis.
    m_prev = m_sc[...]
    m_new = jnp.maximum(m_prev, jnp.max(s, axis=-1, keepdims=True))
    alpha = jnp.exp(m_prev - m_new)
    p = jnp.exp(s - m_new)
    l_sc[...] = alpha * l_sc[...] + jnp.sum(p, axis=-1, keepdims=True)
    acc_sc[...] = alpha * acc_sc[...] + jnp.dot(
        p.astype(v.dtype), v, preferred_element_type=jnp.float32)
    m_sc[...] = m_new

    @pl.when(si == pl.num_programs(3) - 1)
    def _finalize():
        # Exact divide (once per L-tile, off the inner loop).  The approx EUP
        # reciprocal carried ~1% relative error and broke the tolerance check.
        o_ref[0, 0] = (acc_sc[...] / l_sc[...]).astype(o_ref.dtype)


def quaternion_attention(queries, keys, values, q_omegas, q_thetas,
                         k_omegas, k_thetas, attn_mask=None, scale=None,
                         block_q=256, block_k=256, use_bf16_matmul=True,
                         vmem_limit_bytes=None):
    """Pallas QuaternionAttention.forward (eval, mask_flag=False)."""
    del attn_mask  # TODO(synk): mask_flag=True causal path not implemented.
    B, L, H, E = queries.shape
    _, S, _, D = values.shape
    M = q_omegas.shape[-1]
    assert E % 4 == 0, "feature dim must split into 4 quaternion chunks"
    scale = scale if scale is not None else 1.0 / math.sqrt(E)

    f32 = jnp.float32
    dot_dtype = jnp.bfloat16 if use_bf16_matmul else f32

    # Angles use GLOBAL positions (matches the register_buffer) so the L/S
    # tiling in the kernel never sees position bookkeeping.  cos/sin are
    # precomputed here (scale/M folded into the query side) and streamed as
    # packed (..., 2M) tensors -> no per-step trig / scaling in the kernel.
    q_pos = (jnp.arange(L, dtype=f32) / L).reshape(1, L, 1, 1)
    k_pos = (jnp.arange(S, dtype=f32) / S).reshape(1, S, 1, 1)
    q_ang = q_omegas.astype(f32) * q_pos + q_thetas.astype(f32)
    k_ang = k_omegas.astype(f32) * k_pos + k_thetas.astype(f32)
    som = scale / M
    q_trig = jnp.concatenate([jnp.cos(q_ang) * som, jnp.sin(q_ang) * som], -1)
    k_trig = jnp.concatenate([jnp.cos(k_ang), jnp.sin(k_ang)], -1)

    # (B, seq, H, feat) -> (B, H, seq, feat).
    qT = jnp.transpose(queries.astype(f32), (0, 2, 1, 3))
    kT = jnp.transpose(keys.astype(f32), (0, 2, 1, 3))
    vT = jnp.transpose(values, (0, 2, 1, 3))
    vT = vT.astype(dot_dtype) if use_bf16_matmul else vT
    qtT = jnp.transpose(q_trig, (0, 2, 1, 3))
    ktT = jnp.transpose(k_trig, (0, 2, 1, 3))

    # Tile selection (128-friendly, VMEM-bounded) + zero padding for ragged
    # lengths; padded keys are masked inside the kernel, padded queries are
    # sliced off after the call.
    tL = _pick_tile(L, block_q)
    tS = _pick_tile(S, block_k)
    Lp = _round_up(L, tL)
    Sp = _round_up(S, tS)
    if Lp != L:
        pad = [(0, 0), (0, 0), (0, Lp - L), (0, 0)]
        qT, qtT = jnp.pad(qT, pad), jnp.pad(qtT, pad)
    if Sp != S:
        pad = [(0, 0), (0, 0), (0, Sp - S), (0, 0)]
        kT, ktT, vT = jnp.pad(kT, pad), jnp.pad(ktT, pad), jnp.pad(vT, pad)
    nL, nS = Lp // tL, Sp // tS

    def q_spec(feat):
        return pl.BlockSpec((1, 1, tL, feat), lambda b, h, li, si: (b, h, li, 0))

    def k_spec(feat):
        return pl.BlockSpec((1, 1, tS, feat), lambda b, h, li, si: (b, h, si, 0))

    out = pl.pallas_call(
        partial(_quat_attn_kernel, kv_len=S, mask_tail=(Sp != S)),
        out_shape=jax.ShapeDtypeStruct((B, H, Lp, D), jnp.float32),
        grid=(B, H, nL, nS),
        in_specs=[q_spec(E), q_spec(2 * M), k_spec(E), k_spec(2 * M), k_spec(D)],
        out_specs=q_spec(D),
        scratch_shapes=[
            pltpu.VMEM((tL, 1), jnp.float32),      # running row max
            pltpu.VMEM((tL, 1), jnp.float32),      # running row sum
            pltpu.VMEM((tL, D), jnp.float32),      # output accumulator
            pltpu.VMEM((tL, M * E), dot_dtype),    # Q rotation slab (hoisted)
            pltpu.VMEM((tS, M * E), dot_dtype),    # K rotation slab
        ],
        compiler_params=pltpu.CompilerParams(
            dimension_semantics=("parallel", "parallel", "parallel", "arbitrary"),
            vmem_limit_bytes=vmem_limit_bytes),
    )(qT, qtT, kT, ktT, vT)

    if Lp != L:
        out = out[:, :, :L, :]
    return jnp.transpose(out, (0, 2, 1, 3))        # (B, L, H, D)


def quaternion_attention_reference(queries, keys, values, q_omegas, q_thetas,
                                   k_omegas, k_thetas, scale=None):
    """Direct JAX transcription of the PyTorch forward, for verification."""
    B, L, H, E = queries.shape
    S = keys.shape[1]
    M = q_omegas.shape[-1]
    q_pos = (jnp.arange(L, dtype=jnp.float32) / L).reshape(-1, 1, 1)
    k_pos = (jnp.arange(S, dtype=jnp.float32) / S).reshape(-1, 1, 1)
    Qa = q_omegas * q_pos + q_thetas
    Ka = k_omegas * k_pos + k_thetas
    Qc, Qs = jnp.cos(Qa), jnp.sin(Qa)
    Kc, Ks = jnp.cos(Ka), jnp.sin(Ka)
    Qq = jnp.split(queries, 4, axis=-1)
    Kq = jnp.split(keys, 4, axis=-1)
    ein = lambda x, t: jnp.einsum('bshe,bshm->bshme', x, t)
    Q_rot = jnp.concatenate(
        [ein(Qq[0], Qc) - ein(Qq[1], Qs), ein(Qq[1], Qc) + ein(Qq[0], Qs),
         ein(Qq[2], Qc) + ein(Qq[3], Qs), ein(Qq[3], Qc) - ein(Qq[2], Qs)],
        axis=-1)
    K_rot = jnp.concatenate(
        [ein(Kq[0], Kc) - ein(Kq[2], Ks), ein(Kq[1], Kc) - ein(Kq[3], Ks),
         ein(Kq[2], Kc) + ein(Kq[0], Ks), ein(Kq[3], Kc) + ein(Kq[1], Ks)],
        axis=-1)
    scale = scale if scale is not None else 1.0 / math.sqrt(E)
    scores = jnp.einsum('blhme,bshme->bhls', Q_rot, K_rot,
                        precision=jax.lax.Precision.HIGHEST) / M
    A = jax.nn.softmax(scale * scores, axis=-1)
    return jnp.einsum('bhls,bshd->blhd', A, values,
                      precision=jax.lax.Precision.HIGHEST)


if __name__ == "__main__":
    B, L, S, H, E, D, M = 2, 8, 8, 2, 32, 32, 4

    key = jax.random.PRNGKey(0)
    ks = jax.random.split(key, 7)
    queries = jax.random.normal(ks[0], (B, L, H, E), dtype=jnp.float32)
    keys_ = jax.random.normal(ks[1], (B, S, H, E), dtype=jnp.float32)
    values = jax.random.normal(ks[2], (B, S, H, D), dtype=jnp.float32)
    q_omegas = jax.random.normal(ks[3], (B, L, H, M), dtype=jnp.float32)
    q_thetas = jax.random.normal(ks[4], (B, L, H, M), dtype=jnp.float32)
    k_omegas = jax.random.normal(ks[5], (B, S, H, M), dtype=jnp.float32)
    k_thetas = jax.random.normal(ks[6], (B, S, H, M), dtype=jnp.float32)

    ref = quaternion_attention_reference(queries, keys_, values, q_omegas,
                                         q_thetas, k_omegas, k_thetas)

    # 1) Exact-precision path (f32 MXU operands): tight check.
    out_f32 = jax.block_until_ready(
        quaternion_attention(queries, keys_, values, q_omegas, q_thetas,
                             k_omegas, k_thetas, use_bf16_matmul=False))
    assert out_f32.shape == (B, L, H, D), out_f32.shape
    err = float(jnp.max(jnp.abs(out_f32 - ref)))
    assert err < 2e-3, f"f32 path max abs err {err}"

    # 2) Performance path (bf16 MXU operands, f32 accumulation): bf16-level
    #    tolerances against the f32 reference.
    out_bf16 = jax.block_until_ready(
        quaternion_attention(queries, keys_, values, q_omegas, q_thetas,
                             k_omegas, k_thetas, use_bf16_matmul=True))
    max_err = float(jnp.max(jnp.abs(out_bf16 - ref)))
    rel_l2 = float(jnp.linalg.norm(out_bf16 - ref) / jnp.linalg.norm(ref))
    assert max_err < 1e-1 and rel_l2 < 4e-2, (max_err, rel_l2)

    # 3) Ragged shapes: exercises the padding + in-kernel key masking path.
    L2_, S2_ = 12, 10
    k2 = jax.random.split(jax.random.PRNGKey(1), 7)
    q2 = jax.random.normal(k2[0], (B, L2_, H, E), dtype=jnp.float32)
    kk2 = jax.random.normal(k2[1], (B, S2_, H, E), dtype=jnp.float32)
    v2 = jax.random.normal(k2[2], (B, S2_, H, D), dtype=jnp.float32)
    qo2 = jax.random.normal(k2[3], (B, L2_, H, M), dtype=jnp.float32)
    qt2 = jax.random.normal(k2[4], (B, L2_, H, M), dtype=jnp.float32)
    ko2 = jax.random.normal(k2[5], (B, S2_, H, M), dtype=jnp.float32)
    kt2 = jax.random.normal(k2[6], (B, S2_, H, M), dtype=jnp.float32)
    out2 = jax.block_until_ready(
        quaternion_attention(q2, kk2, v2, qo2, qt2, ko2, kt2,
                             use_bf16_matmul=False))
    ref2 = quaternion_attention_reference(q2, kk2, v2, qo2, qt2, ko2, kt2)
    err2 = float(jnp.max(jnp.abs(out2 - ref2)))
    assert out2.shape == (B, L2_, H, D) and err2 < 2e-3, (out2.shape, err2)

    print("KERNEL_OK")
</pallas_src>

<mosaic_0001>
module attributes {stable_mosaic.version = 11 : i64} {
  func.func @_quat_attn_kernel(%arg0: i32, %arg1: i32, %arg2: i32, %arg3: i32, %arg4: memref<1x1x8x32xf32, #tpu.memory_space<vmem>>, %arg5: memref<1x1x8x8xf32, #tpu.memory_space<vmem>>, %arg6: memref<1x1x8x32xf32, #tpu.memory_space<vmem>>, %arg7: memref<1x1x8x8xf32, #tpu.memory_space<vmem>>, %arg8: memref<1x1x8x32xf32, #tpu.memory_space<vmem>>, %arg9: memref<1x1x8x32xf32, #tpu.memory_space<vmem>>, %arg10: memref<8x1xf32, #tpu.memory_space<vmem>>, %arg11: memref<8x1xf32, #tpu.memory_space<vmem>>, %arg12: memref<8x32xf32, #tpu.memory_space<vmem>>, %arg13: memref<8x128xf32, #tpu.memory_space<vmem>>, %arg14: memref<8x128xf32, #tpu.memory_space<vmem>>) attributes {dimension_semantics = [#tpu.dimension_semantics<parallel>, #tpu.dimension_semantics<parallel>, #tpu.dimension_semantics<parallel>, #tpu.dimension_semantics<arbitrary>], iteration_bounds = array<i64: 2, 2, 1, 1>, scalar_prefetch = 0 : i64, scratch_operands = 5 : i64, tpu.core_type = #tpu.core_type<tc>, window_params = [{transform_indices = @transform_0, window_bounds = array<i64: 1, 1, 8, 32>}, {transform_indices = @transform_1, window_bounds = array<i64: 1, 1, 8, 8>}, {transform_indices = @transform_2, window_bounds = array<i64: 1, 1, 8, 32>}, {transform_indices = @transform_3, window_bounds = array<i64: 1, 1, 8, 8>}, {transform_indices = @transform_4, window_bounds = array<i64: 1, 1, 8, 32>}, {transform_indices = @transform_5, window_bounds = array<i64: 1, 1, 8, 32>}]} {
    %c0_i32 = arith.constant 0 : i32
    %0 = arith.cmpi eq, %arg3, %c0_i32 : i32
    %1 = arith.extui %0 : i1 to i32
    %c0_i32_0 = arith.constant 0 : i32
    %2 = arith.cmpi ne, %1, %c0_i32_0 : i32
    scf.if %2 {
      %cst_40 = arith.constant -1.000000e+30 : f32
      %80 = vector.broadcast %cst_40 : f32 to vector<8x1xf32>
      %c0_41 = arith.constant 0 : index
      %c0_42 = arith.constant 0 : index
      %81 = vector.load %arg10[%c0_41, %c0_42] : memref<8x1xf32, #tpu.memory_space<vmem>>, vector<8x1xf32>
      tpu.vector_store %arg10[%c0_41, %c0_42], %80 {strides = array<i32>} : memref<8x1xf32, #tpu.memory_space<vmem>>, vector<8x1xf32>,
      %cst_43 = arith.constant 0.000000e+00 : f32
      %82 = vector.broadcast %cst_43 : f32 to vector<8x1xf32>
      %c0_44 = arith.constant 0 : index
      %c0_45 = arith.constant 0 : index
      %83 = vector.load %arg11[%c0_44, %c0_45] : memref<8x1xf32, #tpu.memory_space<vmem>>, vector<8x1xf32>
      tpu.vector_store %arg11[%c0_44, %c0_45], %82 {strides = array<i32>} : memref<8x1xf32, #tpu.memory_space<vmem>>, vector<8x1xf32>,
      %cst_46 = arith.constant 0.000000e+00 : f32
      %84 = vector.broadcast %cst_46 : f32 to vector<8x32xf32>
      %c0_47 = arith.constant 0 : index
      %c0_48 = arith.constant 0 : index
      %85 = vector.load %arg12[%c0_47, %c0_48] : memref<8x32xf32, #tpu.memory_space<vmem>>, vector<8x32xf32>
      tpu.vector_store %arg12[%c0_47, %c0_48], %84 {strides = array<i32>} : memref<8x32xf32, #tpu.memory_space<vmem>>, vector<8x32xf32>,
      %c0_49 = arith.constant 0 : index
      %c0_50 = arith.constant 0 : index
      %c0_51 = arith.constant 0 : index
      %c0_52 = arith.constant 0 : index
      %86 = vector.load %arg4[%c0_49, %c0_50, %c0_51, %c0_52] : memref<1x1x8x32xf32, #tpu.memory_space<vmem>>, vector<1x1x8x32xf32>
      %87 = vector.shape_cast %86 : vector<1x1x8x32xf32> to vector<8x32xf32>
      %c0_53 = arith.constant 0 : index
      %c0_54 = arith.constant 0 : index
      %c0_55 = arith.constant 0 : index
      %c0_56 = arith.constant 0 : index
      %88 = vector.load %arg5[%c0_53, %c0_54, %c0_55, %c0_56] : memref<1x1x8x8xf32, #tpu.memory_space<vmem>>, vector<1x1x8x8xf32>
      %89 = vector.shape_cast %88 : vector<1x1x8x8xf32> to vector<8x8xf32>
      %90 = vector.extract_strided_slice %89 {offsets = [0, 0], sizes = [8, 4], strides = [1, 1]} : vector<8x8xf32> to vector<8x4xf32>
      %91 = vector.extract_strided_slice %89 {offsets = [0, 4], sizes = [8, 4], strides = [1, 1]} : vector<8x8xf32> to vector<8x4xf32>
      %92 = vector.extract_strided_slice %87 {offsets = [0, 0], sizes = [8, 8], strides = [1, 1]} : vector<8x32xf32> to vector<8x8xf32>
      %93 = vector.extract_strided_slice %87 {offsets = [0, 8], sizes = [8, 8], strides = [1, 1]} : vector<8x32xf32> to vector<8x8xf32>
      %94 = vector.extract_strided_slice %87 {offsets = [0, 16], sizes = [8, 8], strides = [1, 1]} : vector<8x32xf32> to vector<8x8xf32>
      %95 = vector.extract_strided_slice %87 {offsets = [0, 24], sizes = [8, 8], strides = [1, 1]} : vector<8x32xf32> to vector<8x8xf32>
      %cst_57 = arith.constant 0.000000e+00 : f32
      %96 = vector.broadcast %cst_57 : f32 to vector<8x8xf32>
      %97 = arith.subf %96, %93 : vector<8x8xf32>
      %cst_58 = arith.constant 0.000000e+00 : f32
      %98 = vector.broadcast %cst_58 : f32 to vector<8x8xf32>
      %99 = arith.subf %98, %94 : vector<8x8xf32>
      %100 = tpu.concatenate %97, %92, %95, %99 in 1 : vector<8x8xf32>, vector<8x8xf32>, vector<8x8xf32>, vector<8x8xf32> -> vector<8x32xf32>
      %101 = vector.extract_strided_slice %90 {offsets = [0, 0], sizes = [8, 1], strides = [1, 1]} : vector<8x4xf32> to vector<8x1xf32>
      %102 = vector.broadcast %101 : vector<8x1xf32> to vector<8x32xf32>
      %103 = arith.mulf %87, %102 : vector<8x32xf32>
      %104 = vector.extract_strided_slice %91 {offsets = [0, 0], sizes = [8, 1], strides = [1, 1]} : vector<8x4xf32> to vector<8x1xf32>
      %105 = vector.broadcast %104 : vector<8x1xf32> to vector<8x32xf32>
      %106 = arith.mulf %100, %105 : vector<8x32xf32>
      %107 = arith.addf %103, %106 : vector<8x32xf32>
      %c0_59 = arith.constant 0 : index
      %c0_60 = arith.constant 0 : index
      %108 = vector.load %arg13[%c0_59, %c0_60] : memref<8x128xf32, #tpu.memory_space<vmem>>, vector<8x32xf32>
      tpu.vector_store %arg13[%c0_59, %c0_60], %107 {strides = array<i32>} : memref<8x128xf32, #tpu.memory_space<vmem>>, vector<8x32xf32>,
      %109 = vector.extract_strided_slice %90 {offsets = [0, 1], sizes = [8, 1], strides = [1, 1]} : vector<8x4xf32> to vector<8x1xf32>
      %110 = vector.broadcast %109 : vector<8x1xf32> to vector<8x32xf32>
      %111 = arith.mulf %87, %110 : vector<8x32xf32>
      %112 = vector.extract_strided_slice %91 {offsets = [0, 1], sizes = [8, 1], strides = [1, 1]} : vector<8x4xf32> to vector<8x1xf32>
      %113 = vector.broadcast %112 : vector<8x1xf32> to vector<8x32xf32>
      %114 = arith.mulf %100, %113 : vector<8x32xf32>
      %115 = arith.addf %111, %114 : vector<8x32xf32>
      %c0_61 = arith.constant 0 : index
      %c32_62 = arith.constant 32 : index
      %116 = vector.load %arg13[%c0_61, %c32_62] : memref<8x128xf32, #tpu.memory_space<vmem>>, vector<8x32xf32>
      tpu.vector_store %arg13[%c0_61, %c32_62], %115 {strides = array<i32>} : memref<8x128xf32, #tpu.memory_space<vmem>>, vector<8x32xf32>,
      %117 = vector.extract_strided_slice %90 {offsets = [0, 2], sizes = [8, 1], strides = [1, 1]} : vector<8x4xf32> to vector<8x1xf32>
      %118 = vector.broadcast %117 : vector<8x1xf32> to vector<8x32xf32>
      %119 = arith.mulf %87, %118 : vector<8x32xf32>
      %120 = vector.extract_strided_slice %91 {offsets = [0, 2], sizes = [8, 1], strides = [1, 1]} : vector<8x4xf32> to vector<8x1xf32>
      %121 = vector.broadcast %120 : vector<8x1xf32> to vector<8x32xf32>
      %122 = arith.mulf %100, %121 : vector<8x32xf32>
      %123 = arith.addf %119, %122 : vector<8x32xf32>
      %c0_63 = arith.constant 0 : index
      %c64_64 = arith.constant 64 : index
      %124 = vector.load %arg13[%c0_63, %c64_64] : memref<8x128xf32, #tpu.memory_space<vmem>>, vector<8x32xf32>
      tpu.vector_store %arg13[%c0_63, %c64_64], %123 {strides = array<i32>} : memref<8x128xf32, #tpu.memory_space<vmem>>, vector<8x32xf32>,
      %125 = vector.extract_strided_slice %90 {offsets = [0, 3], sizes = [8, 1], strides = [1, 1]} : vector<8x4xf32> to vector<8x1xf32>
      %126 = vector.broadcast %125 : vector<8x1xf32> to vector<8x32xf32>
      %127 = arith.mulf %87, %126 : vector<8x32xf32>
      %128 = vector.extract_strided_slice %91 {offsets = [0, 3], sizes = [8, 1], strides = [1, 1]} : vector<8x4xf32> to vector<8x1xf32>
      %129 = vector.broadcast %128 : vector<8x1xf32> to vector<8x32xf32>
      %130 = arith.mulf %100, %129 : vector<8x32xf32>
      %131 = arith.addf %127, %130 : vector<8x32xf32>
      %c0_65 = arith.constant 0 : index
      %c96_66 = arith.constant 96 : index
      %132 = vector.load %arg13[%c0_65, %c96_66] : memref<8x128xf32, #tpu.memory_space<vmem>>, vector<8x32xf32>
      tpu.vector_store %arg13[%c0_65, %c96_66], %131 {strides = array<i32>} : memref<8x128xf32, #tpu.memory_space<vmem>>, vector<8x32xf32>,
    } else {
    }
    %c0 = arith.constant 0 : index
    %c0_1 = arith.constant 0 : index
    %c0_2 = arith.constant 0 : index
    %c0_3 = arith.constant 0 : index
    %3 = vector.load %arg6[%c0, %c0_1, %c0_2, %c0_3] : memref<1x1x8x32xf32, #tpu.memory_space<vmem>>, vector<1x1x8x32xf32>
    %4 = vector.shape_cast %3 : vector<1x1x8x32xf32> to vector<8x32xf32>
    %c0_4 = arith.constant 0 : index
    %c0_5 = arith.constant 0 : index
    %c0_6 = arith.constant 0 : index
    %c0_7 = arith.constant 0 : index
    %5 = vector.load %arg7[%c0_4, %c0_5, %c0_6, %c0_7] : memref<1x1x8x8xf32, #tpu.memory_space<vmem>>, vector<1x1x8x8xf32>
    %6 = vector.shape_cast %5 : vector<1x1x8x8xf32> to vector<8x8xf32>
    %c0_8 = arith.constant 0 : index
    %c0_9 = arith.constant 0 : index
    %c0_10 = arith.constant 0 : index
    %c0_11 = arith.constant 0 : index
    %7 = vector.load %arg8[%c0_8, %c0_9, %c0_10, %c0_11] : memref<1x1x8x32xf32, #tpu.memory_space<vmem>>, vector<1x1x8x32xf32>
    %8 = vector.shape_cast %7 : vector<1x1x8x32xf32> to vector<8x32xf32>
    %9 = vector.extract_strided_slice %6 {offsets = [0, 0], sizes = [8, 4], strides = [1, 1]} : vector<8x8xf32> to vector<8x4xf32>
    %10 = vector.extract_strided_slice %6 {offsets = [0, 4], sizes = [8, 4], strides = [1, 1]} : vector<8x8xf32> to vector<8x4xf32>
    %11 = vector.extract_strided_slice %4 {offsets = [0, 0], sizes = [8, 8], strides = [1, 1]} : vector<8x32xf32> to vector<8x8xf32>
    %12 = vector.extract_strided_slice %4 {offsets = [0, 8], sizes = [8, 8], strides = [1, 1]} : vector<8x32xf32> to vector<8x8xf32>
    %13 = vector.extract_strided_slice %4 {offsets = [0, 16], sizes = [8, 8], strides = [1, 1]} : vector<8x32xf32> to vector<8x8xf32>
    %14 = vector.extract_strided_slice %4 {offsets = [0, 24], sizes = [8, 8], strides = [1, 1]} : vector<8x32xf32> to vector<8x8xf32>
    %cst = arith.constant 0.000000e+00 : f32
    %15 = vector.broadcast %cst : f32 to vector<8x8xf32>
    %16 = arith.subf %15, %13 : vector<8x8xf32>
    %cst_12 = arith.constant 0.000000e+00 : f32
    %17 = vector.broadcast %cst_12 : f32 to vector<8x8xf32>
    %18 = arith.subf %17, %14 : vector<8x8xf32>
    %19 = tpu.concatenate %16, %18, %11, %12 in 1 : vector<8x8xf32>, vector<8x8xf32>, vector<8x8xf32>, vector<8x8xf32> -> vector<8x32xf32>
    %20 = vector.extract_strided_slice %9 {offsets = [0, 0], sizes = [8, 1], strides = [1, 1]} : vector<8x4xf32> to vector<8x1xf32>
    %21 = vector.broadcast %20 : vector<8x1xf32> to vector<8x32xf32>
    %22 = arith.mulf %4, %21 : vector<8x32xf32>
    %23 = vector.extract_strided_slice %10 {offsets = [0, 0], sizes = [8, 1], strides = [1, 1]} : vector<8x4xf32> to vector<8x1xf32>
    %24 = vector.broadcast %23 : vector<8x1xf32> to vector<8x32xf32>
    %25 = arith.mulf %19, %24 : vector<8x32xf32>
    %26 = arith.addf %22, %25 : vector<8x32xf32>
    %c0_13 = arith.constant 0 : index
    %c0_14 = arith.constant 0 : index
    %27 = vector.load %arg14[%c0_13, %c0_14] : memref<8x128xf32, #tpu.memory_space<vmem>>, vector<8x32xf32>
    tpu.vector_store %arg14[%c0_13, %c0_14], %26 {strides = array<i32>} : memref<8x128xf32, #tpu.memory_space<vmem>>, vector<8x32xf32>,
    %28 = vector.extract_strided_slice %9 {offsets = [0, 1], sizes = [8, 1], strides = [1, 1]} : vector<8x4xf32> to vector<8x1xf32>
    %29 = vector.broadcast %28 : vector<8x1xf32> to vector<8x32xf32>
    %30 = arith.mulf %4, %29 : vector<8x32xf32>
    %31 = vector.extract_strided_slice %10 {offsets = [0, 1], sizes = [8, 1], strides = [1, 1]} : vector<8x4xf32> to vector<8x1xf32>
    %32 = vector.broadcast %31 : vector<8x1xf32> to vector<8x32xf32>
    %33 = arith.mulf %19, %32 : vector<8x32xf32>
    %34 = arith.addf %30, %33 : vector<8x32xf32>
    %c0_15 = arith.constant 0 : index
    %c32 = arith.constant 32 : index
    %35 = vector.load %arg14[%c0_15, %c32] : memref<8x128xf32, #tpu.memory_space<vmem>>, vector<8x32xf32>
    tpu.vector_store %arg14[%c0_15, %c32], %34 {strides = array<i32>} : memref<8x128xf32, #tpu.memory_space<vmem>>, vector<8x32xf32>,
    %36 = vector.extract_strided_slice %9 {offsets = [0, 2], sizes = [8, 1], strides = [1, 1]} : vector<8x4xf32> to vector<8x1xf32>
    %37 = vector.broadcast %36 : vector<8x1xf32> to vector<8x32xf32>
    %38 = arith.mulf %4, %37 : vector<8x32xf32>
    %39 = vector.extract_strided_slice %10 {offsets = [0, 2], sizes = [8, 1], strides = [1, 1]} : vector<8x4xf32> to vector<8x1xf32>
    %40 = vector.broadcast %39 : vector<8x1xf32> to vector<8x32xf32>
    %41 = arith.mulf %19, %40 : vector<8x32xf32>
    %42 = arith.addf %38, %41 : vector<8x32xf32>
    %c0_16 = arith.constant 0 : index
    %c64 = arith.constant 64 : index
    %43 = vector.load %arg14[%c0_16, %c64] : memref<8x128xf32, #tpu.memory_space<vmem>>, vector<8x32xf32>
    tpu.vector_store %arg14[%c0_16, %c64], %42 {strides = array<i32>} : memref<8x128xf32, #tpu.memory_space<vmem>>, vector<8x32xf32>,
    %44 = vector.extract_strided_slice %9 {offsets = [0, 3], sizes = [8, 1], strides = [1, 1]} : vector<8x4xf32> to vector<8x1xf32>
    %45 = vector.broadcast %44 : vector<8x1xf32> to vector<8x32xf32>
    %46 = arith.mulf %4, %45 : vector<8x32xf32>
    %47 = vector.extract_strided_slice %10 {offsets = [0, 3], sizes = [8, 1], strides = [1, 1]} : vector<8x4xf32> to vector<8x1xf32>
    %48 = vector.broadcast %47 : vector<8x1xf32> to vector<8x32xf32>
    %49 = arith.mulf %19, %48 : vector<8x32xf32>
    %50 = arith.addf %46, %49 : vector<8x32xf32>
    %c0_17 = arith.constant 0 : index
    %c96 = arith.constant 96 : index
    %51 = vector.load %arg14[%c0_17, %c96] : memref<8x128xf32, #tpu.memory_space<vmem>>, vector<8x32xf32>
    tpu.vector_store %arg14[%c0_17, %c96], %50 {strides = array<i32>} : memref<8x128xf32, #tpu.memory_space<vmem>>, vector<8x32xf32>,
    %c0_18 = arith.constant 0 : index
    %c0_19 = arith.constant 0 : index
    %52 = vector.load %arg13[%c0_18, %c0_19] : memref<8x128xf32, #tpu.memory_space<vmem>>, vector<8x128xf32>
    %c0_20 = arith.constant 0 : index
    %c0_21 = arith.constant 0 : index
    %53 = vector.load %arg14[%c0_20, %c0_21] : memref<8x128xf32, #tpu.memory_space<vmem>>, vector<8x128xf32>
    %cst_22 = arith.constant dense<0.000000e+00> : vector<8x8xf32>
    %54 = tpu.matmul %52, %53, %cst_22 {dimension_numbers = #tpu.dot_dimension_numbers<[1], [1], [0], [0], [0, 0, 1, 0], [], []>} : vector<8x128xf32>, vector<8x128xf32>, vector<8x8xf32> -> vector<8x8xf32>
    %c0_23 = arith.constant 0 : index
    %c0_24 = arith.constant 0 : index
    %55 = vector.load %arg10[%c0_23, %c0_24] : memref<8x1xf32, #tpu.memory_space<vmem>>, vector<8x1xf32>
    %cst_25 = arith.constant dense<0xFF800000> : vector<8xf32>
    %56 = vector.multi_reduction <maximumf>, %54, %cst_25 [1] : vector<8x8xf32> to vector<8xf32>
    %57 = vector.shape_cast %56 : vector<8xf32> to vector<8x1xf32>
    %58 = arith.maximumf %55, %57 : vector<8x1xf32>
    %59 = arith.subf %55, %58 : vector<8x1xf32>
    %60 = math.exp %59 : vector<8x1xf32>
    %61 = vector.broadcast %58 : vector<8x1xf32> to vector<8x8xf32>
    %62 = arith.subf %54, %61 : vector<8x8xf32>
    %63 = math.exp %62 : vector<8x8xf32>
    %c0_26 = arith.constant 0 : index
    %c0_27 = arith.constant 0 : index
    %64 = vector.load %arg11[%c0_26, %c0_27] : memref<8x1xf32, #tpu.memory_space<vmem>>, vector<8x1xf32>
    %65 = arith.mulf %60, %64 : vector<8x1xf32>
    %cst_28 = arith.constant dense<0.000000e+00> : vector<8xf32>
    %66 = vector.multi_reduction <add>, %63, %cst_28 [1] : vector<8x8xf32> to vector<8xf32>
    %67 = vector.shape_cast %66 : vector<8xf32> to vector<8x1xf32>
    %68 = arith.addf %65, %67 : vector<8x1xf32>
    %c0_29 = arith.constant 0 : index
    %c0_30 = arith.constant 0 : index
    %69 = vector.load %arg11[%c0_29, %c0_30] : memref<8x1xf32, #tpu.memory_space<vmem>>, vector<8x1xf32>
    tpu.vector_store %arg11[%c0_29, %c0_30], %68 {strides = array<i32>} : memref<8x1xf32, #tpu.memory_space<vmem>>, vector<8x1xf32>,
    %c0_31 = arith.constant 0 : index
    %c0_32 = arith.constant 0 : index
    %70 = vector.load %arg12[%c0_31, %c0_32] : memref<8x32xf32, #tpu.memory_space<vmem>>, vector<8x32xf32>
    %71 = vector.broadcast %60 : vector<8x1xf32> to vector<8x32xf32>
    %72 = arith.mulf %71, %70 : vector<8x32xf32>
    %cst_33 = arith.constant dense<0.000000e+00> : vector<8x32xf32>
    %73 = tpu.matmul %63, %8, %cst_33 {dimension_numbers = #tpu.dot_dimension_numbers<[1], [0], [0], [1], [0, 0, 1, 1], [], []>} : vector<8x8xf32>, vector<8x32xf32>, vector<8x32xf32> -> vector<8x32xf32>
    %74 = arith.addf %72, %73 : vector<8x32xf32>
    %c0_34 = arith.constant 0 : index
    %c0_35 = arith.constant 0 : index
    %75 = vector.load %arg12[%c0_34, %c0_35] : memref<8x32xf32, #tpu.memory_space<vmem>>, vector<8x32xf32>
    tpu.vector_store %arg12[%c0_34, %c0_35], %74 {strides = array<i32>} : memref<8x32xf32, #tpu.memory_space<vmem>>, vector<8x32xf32>,
    %c0_36 = arith.constant 0 : index
    %c0_37 = arith.constant 0 : index
    %76 = vector.load %arg10[%c0_36, %c0_37] : memref<8x1xf32, #tpu.memory_space<vmem>>, vector<8x1xf32>
    tpu.vector_store %arg10[%c0_36, %c0_37], %58 {strides = array<i32>} : memref<8x1xf32, #tpu.memory_space<vmem>>, vector<8x1xf32>,
    %c0_i32_38 = arith.constant 0 : i32
    %77 = arith.cmpi eq, %arg3, %c0_i32_38 : i32
    %78 = arith.extui %77 : i1 to i32
    %c0_i32_39 = arith.constant 0 : i32
    %79 = arith.cmpi ne, %78, %c0_i32_39 : i32
    scf.if %79 {
      %c0_40 = arith.constant 0 : index
      %c0_41 = arith.constant 0 : index
      %80 = vector.load %arg12[%c0_40, %c0_41] : memref<8x32xf32, #tpu.memory_space<vmem>>, vector<8x32xf32>
      %c0_42 = arith.constant 0 : index
      %c0_43 = arith.constant 0 : index
      %81 = vector.load %arg11[%c0_42, %c0_43] : memref<8x1xf32, #tpu.memory_space<vmem>>, vector<8x1xf32>
      %82 = vector.broadcast %81 : vector<8x1xf32> to vector<8x32xf32>
      %83 = arith.divf %80, %82 : vector<8x32xf32>
      %c0_44 = arith.constant 0 : index
      %c0_45 = arith.constant 0 : index
      %c0_46 = arith.constant 0 : index
      %c0_47 = arith.constant 0 : index
      %84 = vector.load %arg9[%c0_44, %c0_45, %c0_46, %c0_47] : memref<1x1x8x32xf32, #tpu.memory_space<vmem>>, vector<1x1x8x32xf32>
      %85 = vector.shape_cast %84 : vector<1x1x8x32xf32> to vector<8x32xf32>
      %86 = vector.shape_cast %83 : vector<8x32xf32> to vector<1x1x8x32xf32>
      tpu.vector_store %arg9[%c0_44, %c0_45, %c0_46, %c0_47], %86 {strides = array<i32>} : memref<1x1x8x32xf32, #tpu.memory_space<vmem>>, vector<1x1x8x32xf32>,
    } else {
    }
    return
  }
  func.func @transform_0(%arg0: i32, %arg1: i32, %arg2: i32, %arg3: i32) -> (i32, i32, i32, i32) {
    %c0_i32 = arith.constant 0 : i32
    %c0_i32_0 = arith.constant 0 : i32
    return %arg0, %arg1, %arg2, %c0_i32 : i32, i32, i32, i32
  }
  func.func @transform_1(%arg0: i32, %arg1: i32, %arg2: i32, %arg3: i32) -> (i32, i32, i32, i32) {
    %c0_i32 = arith.constant 0 : i32
    %c0_i32_0 = arith.constant 0 : i32
    return %arg0, %arg1, %arg2, %c0_i32 : i32, i32, i32, i32
  }
  func.func @transform_2(%arg0: i32, %arg1: i32, %arg2: i32, %arg3: i32) -> (i32, i32, i32, i32) {
    %c0_i32 = arith.constant 0 : i32
    %c0_i32_0 = arith.constant 0 : i32
    return %arg0, %arg1, %arg3, %c0_i32 : i32, i32, i32, i32
  }
  func.func @transform_3(%arg0: i32, %arg1: i32, %arg2: i32, %arg3: i32) -> (i32, i32, i32, i32) {
    %c0_i32 = arith.constant 0 : i32
    %c0_i32_0 = arith.constant 0 : i32
    return %arg0, %arg1, %arg3, %c0_i32 : i32, i32, i32, i32
  }
  func.func @transform_4(%arg0: i32, %arg1: i32, %arg2: i32, %arg3: i32) -> (i32, i32, i32, i32) {
    %c0_i32 = arith.constant 0 : i32
    %c0_i32_0 = arith.constant 0 : i32
    return %arg0, %arg1, %arg3, %c0_i32 : i32, i32, i32, i32
  }
  func.func @transform_5(%arg0: i32, %arg1: i32, %arg2: i32, %arg3: i32) -> (i32, i32, i32, i32) {
    %c0_i32 = arith.constant 0 : i32
    %c0_i32_0 = arith.constant 0 : i32
    return %arg0, %arg1, %arg2, %c0_i32 : i32, i32, i32, i32
  }
}

</mosaic_0001>

<bundles_post_ra>
// kernel: tpu_custom_call.1
= control target key start
LH: loop header
LB: loop body
LE: loop exit
PB: predicated region body
PF: predicated region fallthrough
CT: control target
= control target key end

     0   :  { %s1675_s0 = inlined_call_operand.hbm [shape: f32[2,2,8,32], index: 0, kind: input, shape index: {}]   ;;  %s1676_s1 = inlined_call_operand.hbm [shape: f32[2,2,8,8], index: 1, kind: input, shape index: {}]   ;;  %s1677_s2 = inlined_call_operand.hbm [shape: f32[2,2,8,32], index: 2, kind: input, shape index: {}]   ;;  %s1678_s3 = inlined_call_operand.hbm [shape: f32[2,2,8,8], index: 3, kind: input, shape index: {}]   ;;  %s1679_s4 = inlined_call_operand.hbm [shape: f32[2,2,8,32], index: 4, kind: input, shape index: {}]   ;;  %s1680_s5 = inlined_call_operand.hbm [shape: f32[2,2,8,32], index: 5, kind: output, shape index: {}]  }
   0x1   :  { %1689 = sst [smem:[#allocation29_spill]] %s1675_s0 }
   0x2   :  { %1690 = sst [smem:[#allocation30_spill]] %s1676_s1 }
   0x3   :  { %1691 = sst [smem:[#allocation31_spill]] %s1678_s3 }
   0x4   :  { %10 = vsyncpa [#allocation8], 0 }
   0x5   :  { %12 = vsyncpa [#allocation8 + $0x1], 0 }
   0x6   :  { %13 = vsyncpa [#allocation11], 0 }
   0x7   :  { %15 = vsyncpa [#allocation11 + $0x1], 0 }
   0x8   :  { %16 = vsyncpa [#allocation14], 0 }
   0x9   :  { %18 = vsyncpa [#allocation14 + $0x1], 0 }
   0xa   :  { %19 = vsyncpa [#allocation9], 0 }
   0xb   :  { %21 = vsyncpa [#allocation9 + $0x1], 0  ;;  %s1423_s18 = smov 0   ;;  %s1425_s19 = smov 0  }
   0xc   :  { %s1427_s20 = smov 0   ;;  %s1429_s21 = smov 0  }
   0xd   :  { %s1431_s22 = smov 0   ;;  %s1433_s23 = smov 0  }
   0xe   :  { %s1435_s24 = smov 0   ;;  %s1437_s25 = smov 0  }
   0xf LB: > { %1692 = sst [smem:[#allocation21_spill]] %s1346_s18  ;;  %s1464_s26 = sadd.s32 4294967295, %s1374_s25   ;;  %s1374_s25 = sphi %s1437_s25, %s27_s25   ;;  %s1370_s24 = sphi %s1435_s24, %s1717_s24   ;;  %s1366_s23 = sphi %s1433_s23, %s1716_s23   ;;  %s1362_s22 = sphi %s1431_s22, %s1715_s22   ;;  %s1358_s21 = sphi %s1429_s21, %s1714_s21   ;;  %s1354_s20 = sphi %s1427_s20, %s1713_s20   ;;  %s1350_s19 = sphi %s1425_s19, %s1719_s19   ;;  %s1346_s18 = sphi %s1423_s18, %s1718_s18  }
  0x10   : > { %1693 = sst [smem:[#allocation22_spill]] %s1354_s20  ;;  %s951_s27 = sadd.s32 4294967294, %s1374_s25  }
  0x11   : > { %1694 = sst [smem:[#allocation23_spill]] %s1366_s23  ;;  %s49_s28 = sadd.s32 1, %s1366_s23 }
  0x12   : > { %1695 = sst [smem:[#allocation24_spill]] %s1370_s24  ;;  %s53_s29 = sadd.s32 1, %s1370_s24 }
  0x13   : > { %p51_p0 = scmp.ge.s32.totalorder %s49_s28, 2  ;;  %s64_s30 = sadd.s32 1, %s1354_s20 }
  0x14   : > { %p71_p1 = scmp.ne.s32.totalorder %s1354_s20, %s1350_s19  ;;  %p72_p2 = scmp.eq.s32.totalorder %s1374_s25, 0 }
  0x15   : > { %s1721_s28 = smov (%p51_p0, %s49_s28), 0  ;;  %s1723_s29 = smov (!%p51_p0, %s53_s29), %s1370_s24 }
  0x16   : > { %1696 = sst [smem:[#allocation25_spill]] %s1721_s28  ;;  %s58_s6 = ssub.s32 %s1366_s23, %s1721_s28 }
  0x17   : > { %p1478_p3 = por %p72_p2, %p71_p1  ;;  %p55_p4 = scmp.ge.s32.totalorder %s1723_s29, 2 }
  0x18   : > { %p77_p5 = scmp.ne.s32.totalorder %s1350_s19, %s1346_s18  ;;  %p78_p6 = scmp.eq.s32.totalorder %s1464_s26, 0 }
  0x19   : > { %p225_p7 = scmp.eq.s32.totalorder %s1464_s26, 3  ;;  %s1725_s29 = smov (%p55_p4, %s1723_s29), 0 }
  0x1a   : > { %1698 = sst [smem:[#allocation26_spill]] %s1725_s29  ;;  %p1488_p8 = por %p78_p6, %p77_p5 }
  0x1b   : > { %p1492_p9 = por %p225_p7, %p71_p1  ;;  %s57_s10 = ssub.s32 %s1370_s24, %s1725_s29 }
  0x1c   : > { %p231_p10 = scmp.eq.s32.totalorder %s951_s27, 3  ;;  %s59_s11 = sor.u32 %s58_s6, %s57_s10 }
  0x1d   : > { %p62_p11 = scmp.eq.s32.totalorder %s59_s11, 0  ;;  %p1014_p13 = scmp.lt.s32.totalorder %s1374_s25, 4 }
  0x1e   : > { %p1498_p12 = por %p231_p10, %p77_p5  ;;  %s1681_s13 = sand.u32 1, %s1354_s20  }
  0x1f   : > { %s1505_s14 = scalar_select %p62_p11, %s1354_s20, %s64_s30  }
  0x20   : > { %s1701_s12 = scalar_select %p1498_p12, 1, 0 }
  0x21   : > { %1703 = sst [smem:[#allocation28_spill]] %s1505_s14  ;;  %s1509_s15 = sshll.u32 %s1681_s13, 3 }
  0x22   : > { %1702 = sst [smem:[#allocation27_spill]] %s1701_s12  ;;  %s955_s16 = sshll.u32 %s1370_s24, 1 }
  0x23   : > { %s260_s17 = sadd.s32 %s1366_s23, %s955_s16  ;;  %p1515_p0 = pnand %p1014_p13, %p1478_p3 }
  0x24   : > { %s1519_s6 = sshll.u32 %s260_s17, 3  ;;  %s273_s30 = sand.u32 1, %s1374_s25  }
  0x25   : > { %s1705_s1 = sld [smem:[#allocation30_spill]]  ;;  %s277_s28 = scalar_lea.vmem [#allocation10], %s1509_s15 }
  0x26   : > { %s288_s16 = sshll.u32 %s277_s28, 4  ;;  %s274_s7 = scalar_lea.sflag [#allocation11], %s273_s30  ;;  %s289_s16 = int_to_ptr.vmem [resolvable:$true] %s288_s16 }
  0x27   : > { %p969_p1 = scmp.ge.s32.totalorder %s1374_s25, 1  ;;  %p359_p2 = scmp.lt.s32.totalorder %s1374_s25, 5 }
  0x28   : > { %s1707_s3 = sld [smem:[#allocation31_spill]]  ;;  %s255_s10 = scalar_lea.vmem [#allocation7], %s1509_s15 }
  0x29   : > { %p1531_p3 = pnand %p969_p1, %p359_p2  ;;  %s1708_s0 = sld [smem:[#allocation29_spill]] }
  0x2a   : > { %s266_s11 = sshll.u32 %s255_s10, 4  ;;  %s350_s10 = scalar_lea.hbm %s1679_s4, %s1519_s6  ;;  %s267_s11 = int_to_ptr.vmem [resolvable:$true] %s266_s11 }
  0x2b   : > { %s284_s13 = scalar_lea.hbm %s1705_s1, %s1519_s6  ;;  %s321_s1 = scalar_lea.vmem [#allocation13], %s1509_s15 }
  0x2c   : > { %s286_s29 = sshll.u32 %s284_s13, 4  ;;  %s332_s24 = sshll.u32 %s321_s1, 4  ;;  %s287_s29 = int_to_ptr.hbm [resolvable:$true] %s286_s29  ;;  %s333_s24 = int_to_ptr.vmem [resolvable:$true] %s332_s24 }
  0x2d   : > { %1000 = dma.hbm_to_vmem [thread:$0]  (!%p1515_p0), %s287_s29, 128, %s289_s16, %s274_s7  }
  0x2e   : > { %s328_s13 = scalar_lea.hbm %s1707_s3, %s1519_s6  ;;  %s318_s29 = scalar_lea.sflag [#allocation14], %s273_s30 }
  0x2f   : > { %s330_s28 = sshll.u32 %s328_s13, 4  ;;  %s262_s14 = scalar_lea.hbm %s1708_s0, %s1519_s6  ;;  %s331_s28 = int_to_ptr.hbm [resolvable:$true] %s330_s28 }
  0x30   : > { %1006 = dma.hbm_to_vmem [thread:$0]  (!%p1515_p0), %s331_s28, 128, %s333_s24, %s318_s29  }
  0x31   : > { %s264_s3 = sshll.u32 %s262_s14, 4  ;;  %s1709_s13 = sand.u32 1, %s1354_s20   ;;  %s265_s3 = int_to_ptr.hbm [resolvable:$true] %s264_s3 }
  0x32   : > { %s252_s1 = scalar_lea.sflag [#allocation8], %s1709_s13  ;;  %s306_s24 = scalar_lea.hbm %s1677_s2, %s1519_s6 }
  0x33   : > { %997 = dma.hbm_to_vmem [thread:$0]  (!%p1515_p0), %s265_s3, 128, %s267_s11, %s252_s1  }
  0x34   : > { %s299_s28 = scalar_lea.vmem [#allocation12], %s1509_s15  ;;  %s308_s23 = sshll.u32 %s306_s24, 4  ;;  %s309_s23 = int_to_ptr.hbm [resolvable:$true] %s308_s23 }
  0x35   : > { %s310_s18 = sshll.u32 %s299_s28, 4  ;;  %s343_s0 = scalar_lea.vmem [#allocation15], %s1509_s15  ;;  %s311_s18 = int_to_ptr.vmem [resolvable:$true] %s310_s18 }
  0x36   : > { %1003 = dma.hbm_to_vmem [thread:$0]  (!%p1515_p0), %s309_s23, 128, %s311_s18, %s274_s7  }
  0x37   : > { %s354_s20 = sshll.u32 %s343_s0, 4  ;;  %s352_s13 = sshll.u32 %s350_s10, 4  ;;  %s355_s20 = int_to_ptr.vmem [resolvable:$true] %s354_s20  ;;  %s353_s13 = int_to_ptr.hbm [resolvable:$true] %s352_s13 }
  0x38   : > { %1009 = dma.hbm_to_vmem [thread:$0]  (!%p1515_p0), %s353_s13, 128, %s355_s20, %s318_s29  }
  0x39   : > { %363 = sbr.rel (%p1531_p3) target bundleno = 996 (0x3e4), region = 40  ;;  %s1568_s3 = sand.u32 (!%p1531_p3), 1, %s1350_s19  }
  0x3a   : > { %s1571_s18 = sshll.u32 (!%p1531_p3), %s1568_s3, 3  ;;  %s366_s12 = scalar_lea.sflag (!%p1531_p3), [#allocation8], %s1568_s3 }
  0x3b   : > { %s369_s15 = scalar_lea.vmem (!%p1531_p3), [#allocation7], %s1571_s18 }
  0x3e   : > { %1329 = dma.done.wait (%p1488_p8), %s366_s12, 128  }
  0x3f   : > { %1331 = vsyncadd (%p1488_p8), %s366_s12, 4294967168  ;;  %s375_s0 = sand.u32 1, %s1464_s26   ;;  %s379_s27 = scalar_lea.vmem [#allocation10], %s1571_s18 }
  0x40   : > { %s376_s20 = scalar_lea.sflag [#allocation11], %s375_s0 }
  0x41   : > { %1333 = dma.done.wait (%p1488_p8), %s376_s20, 256  }
  0x42   : > { %1335 = vsyncadd (%p1488_p8), %s376_s20, 4294967040  ;;  %s389_s6 = scalar_lea.vmem [#allocation12], %s1571_s18  ;;  %s396_s7 = scalar_lea.sflag [#allocation14], %s375_s0 }
  0x43   : > { %s399_s17 = scalar_lea.vmem [#allocation13], %s1571_s18 }
  0x44   : > { %1337 = dma.done.wait (%p1488_p8), %s396_s7, 256  }
  0x45   : > { %1339 = vsyncadd (%p1488_p8), %s396_s7, 4294967040  ;;  %v1376_v0 = vmov 1   ;;  %v1377_v1 = vmov 2   ;;  %v554_v2 = vld [vmem:[%s399_s17] sm:$0xff]  ;;  %v1591_v3 = vld [vmem:[%s389_s6] sm:$0xff]  ;;  %s1378_s26 = smov 16  }
  0x46   : > { %1097 = vset.pattern.permute.xlu2 %v1376_v0  ;;  %1099 = vset.pattern.permute.xlu1 %v1377_v1  ;;  %v1593_v4 = vld [vmem:[%s369_s15] sm:$0xff]  ;;  %s1379_s29 = smov 8   ;;  %v556_v5 = vsub.f32 0.0, %v1591_v3  ;;  %v1380_v7 = vmov 5   ;;  %s1381_s8 = smov 112   ;;  %v1383_v8 = vmov 6  }
  0x47   : > { %1103 = vset.pattern.permute.xlu0 %v1376_v0  ;;  %585 = vperm.xlu2 %1097, %v554_v2   ;;  %v468_v6 = vsub.f32 0.0, %v1593_v4  ;;  %s1382_s11 = smov 120   ;;  %v1384_v9 = vmov 3   ;;  %v1385_v10 = vmov 7   ;;  %v467_v11 = vld [vmem:[%s379_s27] sm:$0xff]  ;;  %v1386_v12 = vmov 0  }
  0x48   : > { %562 = vrot.lane.b32.xlu0 %v1591_v3, %s1378_s26  ;;  %474 = vrot.lane.b32.xlu1 %v1593_v4, %s1379_s29  ;;  %v1387_v13 = vmov 4   ;;  %vm485_vm0 = vcmask 130048   ;;  %vm487_vm1 = vcmask 195584   ;;  %s1388_s1 = smov 32   ;;  %s1389_s30 = smov 64   ;;  %vm483_vm2 = vcmask 64512  }
  0x49   : > { %s1390_s24 = smov 96   ;;  %vm464_vm3 = vcmask 261120   ;;  %vm517_vm4 = vcmask 523520   ;;  %vm534_vm5 = vcmask 785920   ;;  %vm551_vm6 = vcmask 1048320   ;;  %s409_s28 = scalar_lea.vmem [#allocation15], %s1571_s18 }
  0x4a   : > { %vm461_vm7 = vcmask 7168   ;;  %s978_s23 = sshll.u32 %s1362_s22, 1  ;;  %s741_s0 = scalar_lea.sflag [#allocation9], %s1568_s3 }
  0x4b   : > { %s752_s16 = sadd.s32 %s1358_s21, %s978_s23  ;;  %s456_s21 = scalar_lea.vmem [#allocation16], %s1571_s18 }
  0x4c   : > { %s979_s14 = sshll.u32 %s752_s16, 3  ;;  %s756_s12 = sshll.u32 %s456_s21, 4  ;;  %s757_s12 = int_to_ptr.vmem [resolvable:$true] %s756_s12 }
  0x4d   : > { %s754_s13 = scalar_lea.hbm %s1680_s5, %s979_s14  ;;  %s1288_s7 = scalar_lea.hbm %s1680_s5, 32 }
  0x4e   : > { %s758_s15 = sshll.u32 %s754_s13, 4  ;;  %s759_s15 = int_to_ptr.hbm [resolvable:$true] %s758_s15 }
  0x4f   : > { %1098 = vset.pattern.permute.xlu2 %v1380_v7  ;;  %s1282_s20 = sshra.s32 %s759_s15, 4  ;;  %s1283_s20 = int_to_ptr.hbm [resolvable:$true] %s1282_s20 }
  0x50   : > { %558 = vrot.lane.b32.xlu0 %v556_v5, %s1381_s8  ;;  %470 = vrot.lane.b32.xlu1 %v468_v6, %s1382_s11  ;;  %s1284_s27 = scalar_lea.hbm %s1283_s20, 8  ;;  %p1289_p7 = scmp.lt.s32.totalorder %s1283_s20, %s1680_s5 }
  0x51   : > { %590 = vperm.xlu2 %1098, %v554_v2   ;;  %p1285_p4 = scmp.ne.s32.totalorder %s1283_s20, %s1284_s27  ;;  %p1290_p8 = scmp.lt.s32.totalorder %s1288_s7, %s1284_s27 }
  0x53   : > { %p1286_p5 = pnand %p1285_p4, %p1492_p9  ;;  %p1291_p10 = por %p1290_p8, %p1289_p7 }
  0x55   : > { %p1287_p6 = pneg %p1286_p5 }
  0x57   : > { %p1292_p11 = pnand %p1291_p10, %p1287_p6 }
  0x58   : > { %477 = vrot.lane.b32.xlu0 %v1593_v4, %s1382_s11  ;;  %602 = vperm.xlu1 %1099, %v554_v2  }
  0x59   : > { %1100 = vset.pattern.permute.xlu2 %v1383_v8 }
  0x5a   : > { %607 = vperm.xlu2 %1100, %v554_v2  }
  0x60   : > { %480 = vrot.lane.b32.xlu0 %v468_v6, %s1379_s29  ;;  %1101 = vset.pattern.permute.xlu1 %v1384_v9 }
  0x61   : > { %619 = vperm.xlu1 %1101, %v554_v2  }
  0x62   : > { %1102 = vset.pattern.permute.xlu2 %v1385_v10 }
  0x63   : > { %624 = vperm.xlu2 %1102, %v554_v2  }
  0x68   : > { %503 = vperm.xlu0 %1103, %v467_v11  }
  0x69   : > { %1104 = vset.pattern.permute.xlu1 %v1380_v7 }
  0x6a   : > { %508 = vperm.xlu1 %1104, %v467_v11  }
  0x6b   : > { %1105 = vset.pattern.permute.xlu2 %v1377_v1 }
  0x6c   : > { %520 = vperm.xlu2 %1105, %v467_v11  }
  0x70   : > { %1108 = vset.pattern.permute.xlu0 %v1385_v10 }
  0x71   : > { %542 = vperm.xlu0 %1108, %v467_v11  }
  0x72   : > { %1106 = vset.pattern.permute.xlu1 %v1383_v8 }
  0x73   : > { %525 = vperm.xlu1 %1106, %v467_v11  }
  0x74   : > { %1107 = vset.pattern.permute.xlu2 %v1384_v9  ;;  %v1391_v9 = vmov -1e+30  }
  0x75   : > { %537 = vperm.xlu2 %1107, %v467_v11   ;;  %462 = vst.msk [vmem:[#allocation2] sm:$0xff] %vm461_vm7, %v1391_v9 }
  0x79   : > { %1111 = vset.pattern.permute.xlu0 %v1386_v12 }
  0x7b   : > { %1109 = vset.pattern.permute.xlu1 %v1386_v12  ;;  %v1392_v12 = vmov 0.0  }
  0x7c   : > { %572 = vperm.xlu1 %1109, %v554_v2   ;;  %463 = vst.msk [vmem:[#allocation3] sm:$0xff] %vm461_vm7, %v1392_v12 }
  0x7d   : > { %1110 = vset.pattern.permute.xlu2 %v1387_v13  ;;  %465 = vst.msk [vmem:[#allocation4] sm:$0xff] %vm464_vm3, %v1392_v12  ;;  %v657_v13 = vld [vmem:[#allocation2] sm:$0xff] }
  0x7e   : > { %577 = vperm.xlu2 %1110, %v554_v2  }
  0x84   : > { %491 = vperm.xlu1 %1109, %v467_v11  }
  0x86   : > { %496 = vperm.xlu2 %1110, %v467_v11  }
  0xa1   : > { %v586_v14 = vpop.permute.xlu2 %585 }
  0xa2   : > { %v588_v23 = vmul.f32 %v586_v14, %v1591_v3 }
  0xab   : > { %v591_v15 = vpop.permute.xlu2 %590 }
  0xb4   : > { %v608_v19 = vpop.permute.xlu2 %607 }
  0xba   : > { %v563_v16 = vpop.permute.xlu0 %562  ;;  %v475_v17 = vpop.permute.xlu1 %474 }
  0xbd   : > { %v625_v30 = vpop.permute.xlu2 %624 }
  0xc2   : > { %v559_v18 = vpop.permute.xlu0 %558  ;;  %v471_v21 = vpop.permute.xlu1 %470 }
  0xc3   : > { %v567_v20 = vsel %vm485_vm0, %v559_v18, %v563_v16  ;;  %v484_v39 = vsel %vm483_vm2, %v471_v21, %v475_v17  ;;  %v555_v17 = vld [vmem:[%s409_s28] sm:$0xff] }
  0xc4   : > { %v569_v22 = vsel %vm487_vm1, %v567_v20, %v563_v16  ;;  %706 = vmatpush.msra.mxu1 %v555_v17 }
  0xc5   : > { %v593_v24 = vmul.f32 %v591_v15, %v569_v22  ;;  %v610_v28 = vmul.f32 %v608_v19, %v569_v22  ;;  %v627_v34 = vmul.f32 %v625_v30, %v569_v22 }
  0xc6   : > { %v521_v36 = vpop.permute.xlu2 %520 }
  0xc7   : > { %v594_v25 = vadd.f32 %v593_v24, %v588_v23  ;;  %v523_v50 = vmul.f32 %v521_v36, %v1593_v4 }
  0xc9   : > { %596 = vrot.lane.b32.xlu0 %v594_v25, %s1388_s1  ;;  %v673_v25 = vld [vmem:[#allocation3] sm:$0xff] }
  0xca   : > { %v478_v26 = vpop.permute.xlu0 %477  ;;  %v603_v27 = vpop.permute.xlu1 %602 }
  0xcb   : > { %v605_v29 = vmul.f32 %v603_v27, %v1591_v3  ;;  %v486_v40 = vsel %vm485_vm0, %v484_v39, %v478_v26 }
  0xcd   : > { %v611_v31 = vadd.f32 %v610_v28, %v605_v29 }
  0xcf   : > { %613 = vrot.lane.b32.xlu1 %v611_v31, %s1389_s30  ;;  %v538_v46 = vpop.permute.xlu2 %537  ;;  %v681_v31 = vld [vmem:[#allocation4] sm:$0xff] }
  0xd0   : > { %v540_v47 = vmul.f32 %v538_v46, %v1593_v4 }
  0xd2   : > { %v481_v32 = vpop.permute.xlu0 %480 }
  0xd3   : > { %v620_v33 = vpop.permute.xlu1 %619  ;;  %v488_v42 = vsel %vm487_vm1, %v486_v40, %v481_v32 }
  0xd4   : > { %v622_v35 = vmul.f32 %v620_v33, %v1591_v3 }
  0xd6   : > { %v628_v37 = vadd.f32 %v627_v34, %v622_v35 }
  0xd8   : > { %630 = vrot.lane.b32.xlu2 %v628_v37, %s1390_s24  ;;  %v578_v55 = vpop.permute.xlu2 %577 }
  0xd9   : > { %v580_v57 = vmul.f32 %v578_v55, %v569_v22 }
  0xda   : > { %v504_v38 = vpop.permute.xlu0 %503 }
  0xdb   : > { %v506_v41 = vmul.f32 %v504_v38, %v1593_v4 }
  0xdc   : > { %v509_v43 = vpop.permute.xlu1 %508 }
  0xdd   : > { %v511_v44 = vmul.f32 %v509_v43, %v488_v42 }
  0xdf   : > { %v512_v45 = vadd.f32 %v511_v44, %v506_v41 }
  0xe0   : > { %v497_v60 = vpop.permute.xlu2 %496 }
  0xe1   : > { %514 = vrot.lane.b32.xlu0 %v512_v45, %s1388_s1  ;;  %v499_v62 = vmul.f32 %v497_v60, %v488_v42 }
  0xe3   : > { %v543_v48 = vpop.permute.xlu0 %542 }
  0xe4   : > { %v545_v49 = vmul.f32 %v543_v48, %v488_v42 }
  0xe5   : > { %v526_v52 = vpop.permute.xlu1 %525 }
  0xe6   : > { %v546_v51 = vadd.f32 %v545_v49, %v540_v47  ;;  %v528_v53 = vmul.f32 %v526_v52, %v488_v42 }
  0xe8   : > { %548 = vrot.lane.b32.xlu2 %v546_v51, %s1390_s24  ;;  %v529_v54 = vadd.f32 %v528_v53, %v523_v50 }
  0xea   : > { %531 = vrot.lane.b32.xlu1 %v529_v54, %s1389_s30 }
  0xee   : > { %v573_v56 = vpop.permute.xlu1 %572 }
  0xef   : > { %v575_v58 = vmul.f32 %v573_v56, %v1591_v3 }
  0xf1   : > { %v581_v59 = vadd.f32 %v580_v57, %v575_v58 }
  0xf3   : > { %583 = vst.msk [vmem:[#allocation6] sm:$0xff] %vm464_vm3, %v581_v59 }
  0xf6   : > { %v492_v61 = vpop.permute.xlu1 %491 }
  0xf7   : > { %v494_v63 = vmul.f32 %v492_v61, %v1593_v4 }
  0xf9   : > { %v500_v0 = vadd.f32 %v499_v62, %v494_v63 }
  0xfb   : > { %501 = vst.msk [vmem:[#allocation5] sm:$0xff] %vm464_vm3, %v500_v0 }
 0x132   : > { %v631_v5 = vpop.permute.xlu2 %630 }
 0x13b   : > { %v597_v1 = vpop.permute.xlu0 %596 }
 0x13c   : > { %600 = vst.msk [vmem:[#allocation6] sm:$0xff] %vm517_vm4, %v597_v1 }
 0x141   : > { %v614_v2 = vpop.permute.xlu1 %613 }
 0x142   : > { %617 = vst.msk [vmem:[#allocation6] sm:$0xff] %vm534_vm5, %v614_v2  ;;  %v549_v8 = vpop.permute.xlu2 %548 }
 0x143   : > { %634 = vst.msk [vmem:[#allocation6] sm:$0xff] %vm551_vm6, %v631_v5 }
 0x14a   : > { %v636_v3 = vld [vmem:[#allocation6] sm:$0xff] }
 0x14b   : > { %652 = vmatpush.xpose.msra.mxu0 %v636_v3 }
 0x153   : > { %v515_v6 = vpop.permute.xlu0 %514 }
 0x154   : > { %518 = vst.msk [vmem:[#allocation5] sm:$0xff] %vm517_vm4, %v515_v6 }
 0x15c   : > { %v532_v7 = vpop.permute.xlu1 %531 }
 0x15d   : > { %535 = vst.msk [vmem:[#allocation5] sm:$0xff] %vm534_vm5, %v532_v7 }
 0x15e   : > { %552 = vst.msk [vmem:[#allocation5] sm:$0xff] %vm551_vm6, %v549_v8 }
 0x165   : > { %v635_v4 = vld [vmem:[#allocation5] sm:$0xff] }
 0x166   : > { %653 = vmatmul.f32.vlgmr.msra.gmra.mxu0 %v635_v4 }
 0x1e3   : > { %v654_v10 = vpop.f32.mrf.mxu0 }
 0x1e4   : > { %v658_v11 = vsel %vm483_vm2, %v654_v10, -inf }
 0x1e5   : > { %659 = vmax.xlane.f32.xlu0 %v658_v11 }
 0x258   : > { %v660_v14 = vpop.xlane.xlu0 %659 }
 0x259   : > { %v661_v15 = vmax.f32 %v657_v13, %v660_v14 }
 0x25b   : > { %v662_v16 = vsub.f32 %v657_v13, %v661_v15  ;;  %713 = vst.msk [vmem:[#allocation2] sm:$0xff] %vm461_vm7, %v661_v15  ;;  %667 = vperm.xlu1 %1109, %v661_v15  }
 0x25d   : > { %v663_v23 = vmul.f32 1.442695, %v662_v16 }
 0x2cd   : > { %v668_v18 = vpop.permute.xlu1 %667 }
 0x2ce   : > { %v670_v19 = vsub.f32 %v654_v10, %v668_v18 }
 0x2d0   : > { %v671_v20 = vmul.f32 1.442695, %v670_v19 }
 0x2d2   : > { %1112 = vpow2.f32 %v671_v20 }
 0x2d3   : > { %1114 = vpow2.f32 %v663_v23 }
 0x2d8   : > { %v1113_v21 = vpop.eup %1112 }
 0x2d9   : > { %976 = vmatmul.msk.f32.vlgmr.msra.gmra.mxu1 %vm483_vm2, %v1113_v21  ;;  %v675_v22 = vsel %vm483_vm2, %v1113_v21, 0.0  ;;  %v1115_v24 = vpop.eup %1114 }
 0x2da   : > { %676 = vadd.xlane.f32.xlu2 %v675_v22  ;;  %v674_v26 = vmul.f32 %v1115_v24, %v673_v25 }
 0x34d   : > { %v677_v27 = vpop.xlane.xlu2 %676 }
 0x34e   : > { %v678_v28 = vadd.f32 %v677_v27, %v674_v26 }
 0x350   : > { %680 = vst.msk [vmem:[#allocation3] sm:$0xff] %vm461_vm7, %v678_v28 }
 0x356   : > { %v708_v36 = vpop.f32.mrf.mxu1 }
 0x357   : > { %v718_v29 = vld [vmem:[#allocation3] sm:$0xff] }
 0x358   : > { %721 = vperm.xlu1 %1109, %v718_v29  }
 0x360   : > { %684 = vperm.xlu1 %1109, %v1115_v24  }
 0x3ca   : > { %v722_v30 = vpop.permute.xlu1 %721 }
 0x3cb   : > { %1116 = vrcp.f32 %v722_v30  ;;  %v735_v41 = vand.u32 2147483648, %v722_v30  ;;  %vm729_vm9 = vweird.f32 %v722_v30  ;;  %v733_v42 = vand.u32 2147483647, %v722_v30 }
 0x3cd   : > { %v736_v44 = vor.u32 1.1754944e-38, %v735_v41  ;;  %vm734_vm11 = vcmp.eq.f32.partialorder %v733_v42, 8.507059e+37 }
 0x3d1   : > { %v1117_v32 = vpop.eup %1116 }
 0x3d2   : > { %v725_v33 = vmul.f32 %v1117_v32, %v722_v30  ;;  %v685_v34 = vpop.permute.xlu1 %684  ;;  %vm730_vm8 = vweird.f32 %v1117_v32 }
 0x3d3   : > { %v687_v35 = vmul.f32 %v685_v34, %v681_v31  ;;  %vm731_vm10 = vmor %vm729_vm9, %vm730_vm8 }
 0x3d4   : > { %v726_v37 = vsub.f32 1.0, %v725_v33 }
 0x3d5   : > { %v711_v38 = vadd.f32 %v708_v36, %v687_v35 }
 0x3d6   : > { %v727_v39 = vmul.f32 %v1117_v32, %v726_v37 }
 0x3d7   : > { %712 = vst.msk [vmem:[#allocation4] sm:$0xff] %vm464_vm3, %v711_v38 }
 0x3d8   : > { %v728_v40 = vadd.f32 %v1117_v32, %v727_v39 }
 0x3da   : > { %v732_v43 = vsel %vm731_vm10, %v1117_v32, %v728_v40 }
 0x3db   : > { %v737_v45 = vsel %vm734_vm11, %v736_v44, %v732_v43 }
 0x3de   : > { %v717_v46 = vld [vmem:[#allocation4] sm:$0xff] }
 0x3df   : > { %v738_v47 = vmul.f32 %v737_v45, %v717_v46 }
 0x3e1   : > { %739 = vst.msk [vmem:[%s456_s21] sm:$0xff] %vm464_vm3, %v738_v47 }
 0x3e2   : > { %1295 = shalt.err (!%p1292_p11)
}
 0x3e3   : > { %992 = dma.vmem_to_hbm [thread:$0]  (%p1492_p9), %s757_s12, 128, %s759_s15, %s741_s0  }
 0x3e4 PF: > { %s1710_s3 = sld [smem:[#allocation21_spill]]  ;;  %p1015_p13 = scmp.ge.s32.totalorder %s1374_s25, 2 }
 0x3e6   : > { %p1011_p0 = pnand %p1015_p13, %p1498_p12 }
 0x3e8   : > { %p1012_p1 = pneg %p1011_p0 }
 0x3ea   : > { %s770_s8 = sand.u32 1, %s1710_s3  }
 0x3eb   : > { %s771_s11 = scalar_lea.sflag [#allocation9], %s770_s8 }
 0x3ec   : > { %1341 = dma.done.wait (%p1012_p1), %s771_s11, 128  }
 0x3ed   : > { %1343 = vsyncadd (%p1012_p1), %s771_s11, 4294967168  ;;  %s27_s25 = sadd.s32 1, %s1374_s25   ;;  %s1712_s1 = sld [smem:[#allocation22_spill]] }
 0x3ee   : > { %p24_p2 = scmp.ge.s32.totalorder %s27_s25, 6   ;;  %s1713_s20 = sld [smem:[#allocation28_spill]] }
 0x3ef   : > { %s1714_s21 = sld [smem:[#allocation23_spill]]  ;;  %s1718_s18 = smov %s1350_s19 }
 0x3f0   : > { %s1715_s22 = sld [smem:[#allocation24_spill]]  ;;  %26 = sbr.rel (!%p24_p2) target bundleno = 15 (0xf), region = 141 }
 0x3f1   : > { %s1716_s23 = sld [smem:[#allocation25_spill]] }
 0x3f2   : > { %s1717_s24 = sld [smem:[#allocation26_spill]] }
 0x3f3   : > { %s1719_s19 = smov %s1712_s1 }
 0x3f5   :  { %777 = vsyncpa [#allocation8], 1 }
 0x3f6   :  { %779 = vsyncpa [#allocation8 + $0x1], 1 }
 0x3f7   :  { %780 = vsyncpa [#allocation11], 1 }
 0x3f8   :  { %782 = vsyncpa [#allocation11 + $0x1], 1 }
 0x3f9   :  { %783 = vsyncpa [#allocation14], 1 }
 0x3fa   :  { %785 = vsyncpa [#allocation14 + $0x1], 1 }
 0x3fb   :  { %786 = vsyncpa [#allocation9], 1 }
 0x3fc   :  { %788 = vsyncpa [#allocation9 + $0x1], 1 }

</bundles_post_ra>
